<compile_context>
chip_gen: v6e
topology: v6e:2x2x1
jax: 0.10.0
libtpu: 0.0.40
codegen_flags: <defaults>
</compile_context>

<pallas_src>
import jax
import jax.numpy as jnp
from jax.experimental import pallas as pl
from jax.experimental.pallas import tpu as pltpu


def critic_kernel(x_ref, w1_ref, w2_ref, pk_ref, o_ref):
    # x_ref : (S, TILE_B) state tile, batch on the 128-wide lane axis.
    # w1_ref: (H, S), w2_ref: (H, H) — VMEM-resident (constant index_map).
    # pk_ref: (H, 4) packed small params: [b1 | b2 | w3^T | b3].
    x = x_ref[...]

    b1 = pk_ref[:, 0:1]          # (H, 1) — broadcasts over lanes (batch)
    b2 = pk_ref[:, 1:2]          # (H, 1)
    w3c = pk_ref[:, 2:3]         # (H, 1) = w3^T
    b3 = pk_ref[0:1, 3:4]        # (1, 1)

    # fc1: (H, S) @ (S, TILE_B) -> (H, TILE_B); f32 accumulation on the MXU.
    h = jnp.dot(w1_ref[...], x, preferred_element_type=jnp.float32) + b1
    h = jnp.maximum(h, 0.0)

    # fc2: (H, H) @ (H, TILE_B) -> (H, TILE_B)
    h = jnp.dot(w2_ref[...], h, preferred_element_type=jnp.float32) + b2
    h = jnp.maximum(h, 0.0)

    # fc3 as VPU multiply + sublane reduce (keeps the tiny matvec off the MXU
    # result FIFO on v5e/v6e; lane-dense (1, TILE_B) output slab).
    v = jnp.sum(w3c * h, axis=0, keepdims=True) + b3
    o_ref[...] = v.astype(o_ref.dtype)


def _round_up(x, m):
    return ((x + m - 1) // m) * m


def _pick_tile_b(batch, *, max_tile_b=8192):
    """Pick the batch (lane) tile as a function of B.

    Tiny batches get a single tile (the ~0.35us per-grid-step overhead
    dominates); larger batches get tiles up to `max_tile_b` lanes while
    keeping >= 2 grid steps so the "parallel" axis can split across v7x's two
    TensorCores.  Tiles are multiples of 128 (lane width).
    """
    if batch < 2 * 1024:                      # not enough rows for two cores
        return min(max_tile_b, _round_up(batch, 128))
    return min(max_tile_b, _round_up(pl.cdiv(batch, 2), 128))


def critic_forward(state, params, *, max_tile_b=8192):
    """state: (B, state_dim), f32 or bf16 (bf16 halves the dominant HBM read;
    accumulation stays f32).  params: PyTorch-layout (out, in) weights and
    (out, 1) biases in f32.  Returns (B, 1) f32 values."""
    B, S = state.shape
    H = params["w1"].shape[0]

    tile_b = _pick_tile_b(B, max_tile_b=max_tile_b)
    assert tile_b % 128 == 0, tile_b
    n_tiles = pl.cdiv(B, tile_b)
    b_pad = n_tiles * tile_b

    # Lane-dense layout: batch on lanes.  Padded columns are zeros and their
    # outputs are sliced off below.
    # TODO(synk): have the PPO rollout producer emit state as (S, B) (and/or
    # bf16) directly so this transpose doesn't cost an extra HBM pass.
    state_t = state.T
    if b_pad != B:
        state_t = jnp.pad(state_t, ((0, 0), (0, b_pad - B)))

    # Pack the tiny per-layer vectors into one VMEM-resident buffer:
    #   col 0 = b1, col 1 = b2, col 2 = w3^T, col 3 = b3 (broadcast).
    packed = jnp.concatenate(
        [params["b1"],
         params["b2"],
         params["w3"].reshape(H, 1),
         jnp.broadcast_to(params["b3"], (H, 1))],
        axis=1).astype(jnp.float32)

    flops = 2 * b_pad * (S * H + H * H + H) + 4 * b_pad * H
    bytes_accessed = (b_pad * S * state_t.dtype.itemsize + b_pad * 4
                      + 4 * (int(params["w1"].size) + int(params["w2"].size)
                             + int(packed.size)))

    out = pl.pallas_call(
        critic_kernel,
        out_shape=jax.ShapeDtypeStruct((1, b_pad), jnp.float32),
        grid=(n_tiles,),
        in_specs=[
            # Streamed, lane-dense state tiles.  (If xprof ever shows this DMA
            # exposed, add pipeline_mode=pl.Buffered(3) here.)
            pl.BlockSpec((S, tile_b), lambda i: (0, i)),
            # Constant-index weights: fetched once, VMEM-resident across grid.
            pl.BlockSpec((H, S), lambda i: (0, 0)),
            pl.BlockSpec((H, H), lambda i: (0, 0)),
            pl.BlockSpec((H, 4), lambda i: (0, 0)),
        ],
        out_specs=pl.BlockSpec((1, tile_b), lambda i: (0, i)),   # lane-dense
        compiler_params=pltpu.CompilerParams(
            dimension_semantics=("parallel",)),
        cost_estimate=pl.CostEstimate(
            flops=flops, transcendentals=0, bytes_accessed=bytes_accessed),
    )(state_t, params["w1"], params["w2"], packed)

    return out[0, :B].reshape(B, 1)


def init_params(key, state_dim, hidden_size):
    """Deterministic PyTorch-style uniform init; weights kept as (out, in)."""
    ks = jax.random.split(key, 6)

    def linear(kw, kb, fan_in, fan_out):
        bound = 1.0 / jnp.sqrt(jnp.float32(fan_in))
        w = jax.random.uniform(kw, (fan_out, fan_in), jnp.float32, -bound, bound)
        b = jax.random.uniform(kb, (fan_out, 1), jnp.float32, -bound, bound)
        return w, b

    w1, b1 = linear(ks[0], ks[1], state_dim, hidden_size)
    w2, b2 = linear(ks[2], ks[3], hidden_size, hidden_size)
    w3, b3 = linear(ks[4], ks[5], hidden_size, 1)
    return {"w1": w1, "b1": b1, "w2": w2, "b2": b2, "w3": w3, "b3": b3}


def critic_ref(state, p):
    """Pure-JAX reference (PyTorch semantics: fc3(relu(fc2(relu(fc1(x))))))."""
    h = state.astype(jnp.float32) @ p["w1"].T + p["b1"].T
    h = jnp.maximum(h, 0.0) @ p["w2"].T + p["b2"].T
    return jnp.maximum(h, 0.0) @ p["w3"].T + p["b3"].T


if __name__ == "__main__":
    STATE_DIM, HIDDEN = 16, 32
    key = jax.random.PRNGKey(0)
    k_state, k_params, k_state2 = jax.random.split(key, 3)
    params = init_params(k_params, STATE_DIM, HIDDEN)

    # 1) Small batch: single-tile grid; B not a multiple of 128 -> padding.
    B1 = 1000
    state1 = jax.random.normal(k_state, (B1, STATE_DIM), jnp.float32)
    out1 = jax.block_until_ready(critic_forward(state1, params))
    exp1 = critic_ref(state1, params)
    assert out1.shape == (B1, 1)
    err1 = float(jnp.max(jnp.abs(out1 - exp1)))
    assert jnp.allclose(out1, exp1, atol=1e-4, rtol=1e-4), err1

    # 2) Larger batch: >=2 grid steps (v7x megacore path) + padded last tile.
    B2 = 5000
    state2 = jax.random.normal(k_state2, (B2, STATE_DIM), jnp.float32)
    out2 = jax.block_until_ready(critic_forward(state2, params))
    exp2 = critic_ref(state2, params)
    assert out2.shape == (B2, 1)
    err2 = float(jnp.max(jnp.abs(out2 - exp2)))
    assert jnp.allclose(out2, exp2, atol=1e-4, rtol=1e-4), err2

    # 3) bf16 state streaming (as if the rollout producer emitted bf16).
    out3 = jax.block_until_ready(critic_forward(state1.astype(jnp.bfloat16), params))
    assert out3.shape == (B1, 1)
    err3 = float(jnp.max(jnp.abs(out3 - exp1)))
    assert jnp.allclose(out3, exp1, atol=3e-2, rtol=3e-2), err3

    print("KERNEL_OK")
</pallas_src>

<mosaic_0001>
module attributes {stable_mosaic.version = 11 : i64} {
  func.func @critic_kernel(%arg0: i32, %arg1: memref<16x1024xf32, #tpu.memory_space<vmem>>, %arg2: memref<32x16xf32, #tpu.memory_space<vmem>>, %arg3: memref<32x32xf32, #tpu.memory_space<vmem>>, %arg4: memref<32x4xf32, #tpu.memory_space<vmem>>, %arg5: memref<1x1024xf32, #tpu.memory_space<vmem>>) attributes {dimension_semantics = [#tpu.dimension_semantics<parallel>], iteration_bounds = array<i64: 1>, scalar_prefetch = 0 : i64, scratch_operands = 0 : i64, tpu.core_type = #tpu.core_type<tc>, window_params = [{transform_indices = @transform_0, window_bounds = array<i64: 16, 1024>}, {pipeline_mode = #tpu.pipeline_mode<synchronous>, transform_indices = @transform_1, window_bounds = array<i64: 32, 16>}, {pipeline_mode = #tpu.pipeline_mode<synchronous>, transform_indices = @transform_2, window_bounds = array<i64: 32, 32>}, {pipeline_mode = #tpu.pipeline_mode<synchronous>, transform_indices = @transform_3, window_bounds = array<i64: 32, 4>}, {transform_indices = @transform_4, window_bounds = array<i64: 1, 1024>}]} {
    %c0 = arith.constant 0 : index
    %c0_0 = arith.constant 0 : index
    %0 = vector.load %arg1[%c0, %c0_0] : memref<16x1024xf32, #tpu.memory_space<vmem>>, vector<16x1024xf32>
    %c0_1 = arith.constant 0 : index
    %c0_2 = arith.constant 0 : index
    %1 = vector.load %arg4[%c0_1, %c0_2] : memref<32x4xf32, #tpu.memory_space<vmem>>, vector<32x1xf32>
    %c0_3 = arith.constant 0 : index
    %c1 = arith.constant 1 : index
    %2 = vector.load %arg4[%c0_3, %c1] : memref<32x4xf32, #tpu.memory_space<vmem>>, vector<32x1xf32>
    %c0_4 = arith.constant 0 : index
    %c2 = arith.constant 2 : index
    %3 = vector.load %arg4[%c0_4, %c2] : memref<32x4xf32, #tpu.memory_space<vmem>>, vector<32x1xf32>
    %c0_5 = arith.constant 0 : index
    %c3 = arith.constant 3 : index
    %4 = vector.load %arg4[%c0_5, %c3] : memref<32x4xf32, #tpu.memory_space<vmem>>, vector<1x1xf32>
    %c0_6 = arith.constant 0 : index
    %c0_7 = arith.constant 0 : index
    %5 = vector.load %arg2[%c0_6, %c0_7] : memref<32x16xf32, #tpu.memory_space<vmem>>, vector<32x16xf32>
    %cst = arith.constant dense<0.000000e+00> : vector<32x1024xf32>
    %6 = tpu.matmul %5, %0, %cst {dimension_numbers = #tpu.dot_dimension_numbers<[1], [0], [0], [1], [0, 0, 1, 1], [], []>} : vector<32x16xf32>, vector<16x1024xf32>, vector<32x1024xf32> -> vector<32x1024xf32>
    %7 = vector.broadcast %1 : vector<32x1xf32> to vector<32x1024xf32>
    %8 = arith.addf %6, %7 : vector<32x1024xf32>
    %cst_8 = arith.constant 0.000000e+00 : f32
    %9 = vector.broadcast %cst_8 : f32 to vector<32x1024xf32>
    %10 = arith.maximumf %8, %9 : vector<32x1024xf32>
    %c0_9 = arith.constant 0 : index
    %c0_10 = arith.constant 0 : index
    %11 = vector.load %arg3[%c0_9, %c0_10] : memref<32x32xf32, #tpu.memory_space<vmem>>, vector<32x32xf32>
    %cst_11 = arith.constant dense<0.000000e+00> : vector<32x1024xf32>
    %12 = tpu.matmul %11, %10, %cst_11 {dimension_numbers = #tpu.dot_dimension_numbers<[1], [0], [0], [1], [0, 0, 1, 1], [], []>} : vector<32x32xf32>, vector<32x1024xf32>, vector<32x1024xf32> -> vector<32x1024xf32>
    %13 = vector.broadcast %2 : vector<32x1xf32> to vector<32x1024xf32>
    %14 = arith.addf %12, %13 : vector<32x1024xf32>
    %cst_12 = arith.constant 0.000000e+00 : f32
    %15 = vector.broadcast %cst_12 : f32 to vector<32x1024xf32>
    %16 = arith.maximumf %14, %15 : vector<32x1024xf32>
    %17 = vector.broadcast %3 : vector<32x1xf32> to vector<32x1024xf32>
    %18 = arith.mulf %17, %16 : vector<32x1024xf32>
    %cst_13 = arith.constant dense<0.000000e+00> : vector<1024xf32>
    %19 = vector.multi_reduction <add>, %18, %cst_13 [0] : vector<32x1024xf32> to vector<1024xf32>
    %20 = vector.shape_cast %19 : vector<1024xf32> to vector<1x1024xf32>
    %21 = vector.broadcast %4 : vector<1x1xf32> to vector<1x1024xf32>
    %22 = arith.addf %20, %21 : vector<1x1024xf32>
    %c0_14 = arith.constant 0 : index
    %c0_15 = arith.constant 0 : index
    %23 = vector.load %arg5[%c0_14, %c0_15] : memref<1x1024xf32, #tpu.memory_space<vmem>>, vector<1x1024xf32>
    tpu.vector_store %arg5[%c0_14, %c0_15], %22 {strides = array<i32>} : memref<1x1024xf32, #tpu.memory_space<vmem>>, vector<1x1024xf32>,
    return
  }
  func.func @transform_0(%arg0: i32) -> (i32, i32) {
    %c0_i32 = arith.constant 0 : i32
    %c0_i32_0 = arith.constant 0 : i32
    return %c0_i32, %arg0 : i32, i32
  }
  func.func @transform_1(%arg0: i32) -> (i32, i32) {
    %c0_i32 = arith.constant 0 : i32
    %c0_i32_0 = arith.constant 0 : i32
    %c0_i32_1 = arith.constant 0 : i32
    return %c0_i32, %c0_i32_0 : i32, i32
  }
  func.func @transform_2(%arg0: i32) -> (i32, i32) {
    %c0_i32 = arith.constant 0 : i32
    %c0_i32_0 = arith.constant 0 : i32
    %c0_i32_1 = arith.constant 0 : i32
    return %c0_i32, %c0_i32_0 : i32, i32
  }
  func.func @transform_3(%arg0: i32) -> (i32, i32) {
    %c0_i32 = arith.constant 0 : i32
    %c0_i32_0 = arith.constant 0 : i32
    %c0_i32_1 = arith.constant 0 : i32
    return %c0_i32, %c0_i32_0 : i32, i32
  }
  func.func @transform_4(%arg0: i32) -> (i32, i32) {
    %c0_i32 = arith.constant 0 : i32
    %c0_i32_0 = arith.constant 0 : i32
    return %c0_i32, %arg0 : i32, i32
  }
}

</mosaic_0001>

<bundles_post_ra>
// kernel: tpu_custom_call.1
= control target key start
LH: loop header
LB: loop body
LE: loop exit
PB: predicated region body
PF: predicated region fallthrough
CT: control target
= control target key end

     0   :  { %9 = vsyncpa [#allocation3], 0  ;;  %s1504_s0 = inlined_call_operand.hbm [shape: f32[16,1024], index: 0, kind: input, shape index: {}]   ;;  %s1505_s1 = inlined_call_operand.vmem [shape: f32[32,16], index: 1, kind: input, shape index: {}]   ;;  %s1506_s2 = inlined_call_operand.vmem [shape: f32[32,32], index: 2, kind: input, shape index: {}]   ;;  %s1507_s3 = inlined_call_operand.vmem [shape: f32[32,4], index: 3, kind: input, shape index: {}]   ;;  %s1508_s4 = inlined_call_operand.hbm [shape: f32[1,1024], index: 4, kind: output, shape index: {}]  }
   0x1   :  { %10 = vsyncpa [#allocation4], 0  ;;  %s1199_s15 = smov [#allocation2]  }
   0x2   :  { %s16_s16 = sshll.u32 %s1199_s15, 4  ;;  %s17_s16 = int_to_ptr.vmem [resolvable:$true] %s16_s16 }
   0x3   :  { %s1163_s17 = scalar_lea.vmem %s17_s16, 2048  ;;  %p1168_p1 = scmp.lt.s32.totalorder %s17_s16, %s17_s16 }
   0x4   :  { %p1164_p0 = scmp.ne.s32.totalorder %s17_s16, %s1163_s17  ;;  %p1169_p2 = scmp.lt.s32.totalorder %s1163_s17, %s1163_s17 }
   0x6   :  { %p1170_p3 = por %p1169_p2, %p1168_p1 }
   0x8   :  { %p1171_p4 = pnand %p1170_p3, %p1164_p0 }
   0xa   :  { %1174 = shalt.err (!%p1171_p4)
}
   0xb   :  { %s1200_s18 = smov 1024   ;;  %s1201_s19 = smov 64  }
   0xc   :  { %22 = dma.hbm_to_vmem [thread:$0]  %s1504_s0, 2048, %s17_s16, [#allocation3], %s1200_s18, %s1200_s18, %s1201_s19  }
   0xd   :  { %1195 = dma.done.wait [#allocation3], 2048  }
   0xe   :  { %1196 = vsyncadd [#allocation3], 4294965248  ;;  %v1202_v0 = vmov 0.0   ;;  %v1203_v1 = vmov 0   ;;  %v41_v2 = vld [vmem:[#allocation2 + $0x48] sm:$0xff]  ;;  %v43_v3 = vld [vmem:[#allocation2 + $0x58] sm:$0xff] }
   0xf   :  { %154 = vmatprep.mubr.f32.mxu0 %v1202_v0  ;;  %243 = vmatprep.mubr.f32.mxu1 %v1202_v0  ;;  %v40_v4 = vld [vmem:[#allocation2 + $0x40] sm:$0xff]  ;;  %v42_v5 = vld [vmem:[#allocation2 + $0x50] sm:$0xff]  ;;  %v33_v6 = vld [vmem:[#allocation2 + $0x8] sm:$0xff]  ;;  %vm77_vm0 = vcmask 130048   ;;  %v1204_v26 = vmov 1   ;;  %v1205_v27 = vmov 2  }
  0x10   :  { %1149 = vset.pattern.permute.xlu1 %v1203_v1  ;;  %1148 = vset.pattern.permute.xlu0 %v1203_v1  ;;  %v35_v7 = vld [vmem:[#allocation2 + $0x18] sm:$0xff]  ;;  %v32_v8 = vld [vmem:[#allocation2] sm:$0xff]  ;;  %v34_v9 = vld [vmem:[#allocation2 + $0x10] sm:$0xff]  ;;  %v1206_v29 = vmov 3   ;;  %vm498_vm1 = vcmask 261120  }
  0x11   :  { %118 = vmatprep.subr.mxu0 %v41_v2  ;;  %207 = vmatprep.subr.mxu1 %v43_v3  ;;  %v53_v10 = vld [vmem:[%s1505_s1] sm:$0xff]  ;;  %v45_v11 = vld [vmem:[#allocation2 + $0x68] sm:$0xff]  ;;  %v47_v12 = vld [vmem:[#allocation2 + $0x78] sm:$0xff] }
  0x12   :  { %119 = vmatpush1.msra.mxu0 %v40_v4  ;;  %208 = vmatpush1.msra.mxu1 %v42_v5  ;;  %v44_v13 = vld [vmem:[#allocation2 + $0x60] sm:$0xff]  ;;  %v46_v14 = vld [vmem:[#allocation2 + $0x70] sm:$0xff]  ;;  %v54_v15 = vld [vmem:[%s1505_s1 + $0x8] sm:$0xff] }
  0x13   :  { %120 = vmatprep.subr.mxu0 %v33_v6  ;;  %209 = vmatprep.subr.mxu1 %v35_v7  ;;  %v37_v16 = vld [vmem:[#allocation2 + $0x28] sm:$0xff]  ;;  %v39_v17 = vld [vmem:[#allocation2 + $0x38] sm:$0xff]  ;;  %v36_v18 = vld [vmem:[#allocation2 + $0x20] sm:$0xff] }
  0x14   :  { %121 = vmatpush1.msra.mxu0 %v32_v8  ;;  %210 = vmatpush1.msra.mxu1 %v34_v9  ;;  %v38_v19 = vld [vmem:[#allocation2 + $0x30] sm:$0xff]  ;;  %v49_v21 = vld [vmem:[%s1507_s3 + $0x8] sm:$0xff]  ;;  %v51_v22 = vld [vmem:[%s1507_s3 + $0x18] sm:$0xff] }
  0x15   :  { %1106 = vmatmul.mubr.msk.f32.vlgmr.msra.gmra.mxu0 %vm77_vm0, %v53_v10  ;;  %1110 = vmatmul.mubr.msk.f32.vlgmr.msra.gmra.mxu1 %vm77_vm0, %v53_v10  ;;  %v55_v20 = vld [vmem:[%s1505_s1 + $0x10] sm:$0xff]  ;;  %v56_v23 = vld [vmem:[%s1505_s1 + $0x18] sm:$0xff]  ;;  %v48_v24 = vld [vmem:[%s1507_s3] sm:$0xff] }
  0x16   :  { %160 = vmatprep.mubr.f32.mxu0 %v1202_v0  ;;  %249 = vmatprep.mubr.f32.mxu1 %v1202_v0  ;;  %v50_v25 = vld [vmem:[%s1507_s3 + $0x10] sm:$0xff]  ;;  %v52_v28 = vld [vmem:[%s1507_s3] sm:$0x1] }
  0x17   :  { %296 = vmatprep.subr.mxu0 %v45_v11  ;;  %385 = vmatprep.subr.mxu1 %v47_v12 }
  0x18   :  { %297 = vmatpush1.msra.mxu0 %v44_v13  ;;  %386 = vmatpush1.msra.mxu1 %v46_v14 }
  0x19   :  { %1107 = vmatmul.mubr.msk.f32.gmra.mxu0 %vm77_vm0, %v54_v15  ;;  %1111 = vmatmul.mubr.msk.f32.gmra.mxu1 %vm77_vm0, %v54_v15 }
  0x1a   :  { %166 = vmatprep.mubr.f32.mxu0 %v1202_v0  ;;  %255 = vmatprep.mubr.f32.mxu1 %v1202_v0 }
  0x1b   :  { %298 = vmatprep.subr.mxu0 %v37_v16  ;;  %387 = vmatprep.subr.mxu1 %v39_v17 }
  0x1c   :  { %299 = vmatpush1.msra.mxu0 %v36_v18  ;;  %388 = vmatpush1.msra.mxu1 %v38_v19 }
  0x1d   :  { %1108 = vmatmul.mubr.msk.f32.gmra.mxu0 %vm77_vm0, %v55_v20  ;;  %1112 = vmatmul.mubr.msk.f32.gmra.mxu1 %vm77_vm0, %v55_v20 }
  0x1e   :  { %172 = vmatprep.mubr.f32.mxu0 %v1202_v0  ;;  %261 = vmatprep.mubr.f32.mxu1 %v1202_v0 }
  0x1f   :  { %64 = vperm.xlu1 %1149, %v49_v21   ;;  %74 = vperm.xlu0 %1148, %v51_v22  }
  0x21   :  { %1109 = vmatmul.mubr.msk.f32.gmra.mxu0 %vm77_vm0, %v56_v23  ;;  %1113 = vmatmul.mubr.msk.f32.gmra.mxu1 %vm77_vm0, %v56_v23 }
  0x22   :  { %332 = vmatprep.mubr.f32.mxu0 %v1202_v0  ;;  %421 = vmatprep.mubr.f32.mxu1 %v1202_v0 }
  0x23   :  { %59 = vperm.xlu1 %1149, %v48_v24   ;;  %69 = vperm.xlu0 %1148, %v50_v25  }
  0x25   :  { %1114 = vmatmul.mubr.msk.f32.vlgmr.msra.gmra.mxu0 %vm77_vm0, %v53_v10  ;;  %1118 = vmatmul.mubr.msk.f32.vlgmr.msra.gmra.mxu1 %vm77_vm0, %v53_v10 }
  0x26   :  { %338 = vmatprep.mubr.f32.mxu0 %v1202_v0  ;;  %427 = vmatprep.mubr.f32.mxu1 %v1202_v0 }
  0x27   :  { %1151 = vset.pattern.permute.xlu1 %v1204_v26  ;;  %1150 = vset.pattern.permute.xlu0 %v1204_v26 }
  0x28   :  { %487 = vperm.xlu1 %1151, %v49_v21   ;;  %483 = vperm.xlu0 %1150, %v48_v24  }
  0x29   :  { %1115 = vmatmul.mubr.msk.f32.gmra.mxu0 %vm77_vm0, %v54_v15  ;;  %1119 = vmatmul.mubr.msk.f32.gmra.mxu1 %vm77_vm0, %v54_v15 }
  0x2a   :  { %344 = vmatprep.mubr.f32.mxu0 %v1202_v0  ;;  %433 = vmatprep.mubr.f32.mxu1 %v1202_v0 }
  0x2c   :  { %491 = vperm.xlu1 %1151, %v50_v25   ;;  %495 = vperm.xlu0 %1150, %v51_v22  }
  0x2d   :  { %1116 = vmatmul.mubr.msk.f32.gmra.mxu0 %vm77_vm0, %v55_v20  ;;  %1120 = vmatmul.mubr.msk.f32.gmra.mxu1 %vm77_vm0, %v55_v20 }
  0x2e   :  { %350 = vmatprep.mubr.f32.mxu0 %v1202_v0  ;;  %439 = vmatprep.mubr.f32.mxu1 %v1202_v0 }
  0x30   :  { %1152 = vset.pattern.permute.xlu1 %v1205_v27  ;;  %1153 = vset.pattern.permute.xlu0 %v1205_v27 }
  0x31   :  { %1117 = vmatmul.mubr.msk.f32.gmra.mxu0 %vm77_vm0, %v56_v23  ;;  %1121 = vmatmul.mubr.msk.f32.gmra.mxu1 %vm77_vm0, %v56_v23 }
  0x32   :  { %575 = vmatprep.mubr.f32.mxu0 %v1202_v0  ;;  %664 = vmatprep.mubr.f32.mxu1 %v1202_v0 }
  0x33   :  { %900 = vperm.xlu1 %1152, %v48_v24   ;;  %904 = vperm.xlu0 %1153, %v49_v21  }
  0x37   :  { %908 = vperm.xlu1 %1152, %v50_v25   ;;  %1154 = vset.pattern.permute.xlu0 %v1206_v29  ;;  %v1337_v29 = vld [vmem:[%s1506_s2] sm:$0xff] }
  0x38   :  { %1021 = vperm.xlu0 %1154, %v52_v28  }
  0x3b   :  { %912 = vperm.xlu1 %1152, %v51_v22  }
  0x9a   :  { %v1298_v38 = vpop.permute.xlu0 %74  ;;  %v1300_v43 = vpop.permute.xlu1 %64 }
  0x9e   :  { %v1302_v46 = vpop.permute.xlu0 %69  ;;  %v1316_v59 = vpop.permute.xlu1 %59 }
  0xd5   :  { %v156_v30 = vpop.f32.mrf.mxu0  ;;  %v245_v31 = vpop.f32.mrf.mxu1 }
  0xd6   :  { %v157_v11 = vadd.f32 %v156_v30, %v1316_v59  ;;  %v246_v12 = vadd.f32 %v245_v31, %v1316_v59 }
  0xd7   :  { %v158_v32 = vpop.f32.mrf.mxu0  ;;  %v247_v33 = vpop.f32.mrf.mxu1 }
  0xd8   :  { %v159_v7 = vadd.f32 %v158_v32, %v1316_v59  ;;  %v248_v8 = vadd.f32 %v247_v33, %v1316_v59  ;;  %v446_v25 = vmax.f32 %v157_v11, 0.0  ;;  %v448_v26 = vmax.f32 %v246_v12, 0.0 }
  0xd9   :  { %v162_v34 = vpop.f32.mrf.mxu0  ;;  %v251_v35 = vpop.f32.mrf.mxu1 }
  0xda   :  { %v163_v1 = vadd.f32 %v162_v34, %v1300_v43  ;;  %v252_v2 = vadd.f32 %v251_v35, %v1300_v43  ;;  %v447_v23 = vmax.f32 %v159_v7, 0.0  ;;  %v449_v24 = vmax.f32 %v248_v8, 0.0  ;;  %v1348_v34 = vld [vmem:[%s1506_s2 + $0x8] sm:$0xff] }
  0xdb   :  { %v164_v36 = vpop.f32.mrf.mxu0  ;;  %v253_v37 = vpop.f32.mrf.mxu1 }
  0xdc   :  { %v165_v60 = vadd.f32 %v164_v36, %v1300_v43  ;;  %v254_v61 = vadd.f32 %v253_v37, %v1300_v43  ;;  %v454_v19 = vmax.f32 %v163_v1, 0.0  ;;  %v456_v20 = vmax.f32 %v252_v2, 0.0  ;;  %v481_v1 = vld [vmem:[%s1506_s2 + $0x18] sm:$0xff] }
  0xdd   :  { %v168_v39 = vpop.f32.mrf.mxu0  ;;  %v257_v40 = vpop.f32.mrf.mxu1 }
  0xde   :  { %v169_v55 = vadd.f32 %v168_v39, %v1302_v46  ;;  %v258_v56 = vadd.f32 %v257_v40, %v1302_v46  ;;  %v455_v17 = vmax.f32 %v165_v60, 0.0  ;;  %v457_v18 = vmax.f32 %v254_v61, 0.0 }
  0xdf   :  { %v170_v41 = vpop.f32.mrf.mxu0  ;;  %v259_v42 = vpop.f32.mrf.mxu1 }
  0xe0   :  { %v171_v51 = vadd.f32 %v170_v41, %v1302_v46  ;;  %v260_v52 = vadd.f32 %v259_v42, %v1302_v46  ;;  %v462_v13 = vmax.f32 %v169_v55, 0.0  ;;  %v464_v14 = vmax.f32 %v258_v56, 0.0 }
  0xe1   :  { %v174_v44 = vpop.f32.mrf.mxu0  ;;  %v263_v45 = vpop.f32.mrf.mxu1 }
  0xe2   :  { %v175_v47 = vadd.f32 %v174_v44, %v1298_v38  ;;  %v264_v48 = vadd.f32 %v263_v45, %v1298_v38  ;;  %v463_v9 = vmax.f32 %v171_v51, 0.0  ;;  %v465_v10 = vmax.f32 %v260_v52, 0.0  ;;  %v480_v45 = vld [vmem:[%s1506_s2 + $0x10] sm:$0xff]  ;;  %s1208_s2 = smov [#allocation5]  }
  0xe3   :  { %v176_v49 = vpop.f32.mrf.mxu0  ;;  %v265_v50 = vpop.f32.mrf.mxu1  ;;  %s1097_s19 = sshll.u32 %s1208_s2, 4  ;;  %s1098_s19 = int_to_ptr.vmem [resolvable:$true] %s1097_s19 }
  0xe4   :  { %v177_v53 = vadd.f32 %v176_v49, %v1298_v38  ;;  %v266_v54 = vadd.f32 %v265_v50, %v1298_v38  ;;  %v470_v3 = vmax.f32 %v175_v47, 0.0  ;;  %v472_v4 = vmax.f32 %v264_v48, 0.0  ;;  %s1175_s20 = scalar_lea.vmem %s1098_s19, 128  ;;  %p1180_p6 = scmp.lt.s32.totalorder %s1098_s19, %s1098_s19 }
  0xe5   :  { %v1312_v57 = vpop.f32.mrf.mxu0  ;;  %v1314_v58 = vpop.f32.mrf.mxu1  ;;  %p1176_p5 = scmp.ne.s32.totalorder %s1098_s19, %s1175_s20  ;;  %p1181_p7 = scmp.lt.s32.totalorder %s1175_s20, %s1175_s20 }
  0xe6   :  { %v471_v62 = vmax.f32 %v177_v53, 0.0  ;;  %v473_v63 = vmax.f32 %v266_v54, 0.0  ;;  %v335_v2 = vadd.f32 %v1312_v57, %v1316_v59 }
  0xe7   :  { %v1322_v5 = vpop.f32.mrf.mxu0  ;;  %v1324_v6 = vpop.f32.mrf.mxu1  ;;  %p1182_p8 = por %p1181_p7, %p1180_p6 }
  0xe8   :  { %535 = vmatprep.subr.mxu0 %v471_v62  ;;  %624 = vmatprep.subr.mxu1 %v473_v63  ;;  %v337_v60 = vadd.f32 %v1322_v5, %v1316_v59  ;;  %v426_v61 = vadd.f32 %v1324_v6, %v1316_v59  ;;  %v450_v57 = vmax.f32 %v335_v2, 0.0 }
  0xe9   :  { %v1330_v15 = vpop.f32.mrf.mxu0  ;;  %v1332_v16 = vpop.f32.mrf.mxu1  ;;  %536 = vmatpush1.msra.mxu0 %v470_v3  ;;  %625 = vmatpush1.msra.mxu1 %v472_v4  ;;  %p1183_p9 = pnand %p1182_p8, %p1176_p5 }
  0xea   :  { %537 = vmatprep.subr.mxu0 %v463_v9  ;;  %626 = vmatprep.subr.mxu1 %v465_v10  ;;  %v341_v56 = vadd.f32 %v1330_v15, %v1300_v43  ;;  %v451_v7 = vmax.f32 %v337_v60, 0.0  ;;  %v453_v8 = vmax.f32 %v426_v61, 0.0 }
  0xeb   :  { %v342_v21 = vpop.f32.mrf.mxu0  ;;  %v431_v22 = vpop.f32.mrf.mxu1  ;;  %538 = vmatpush1.msra.mxu0 %v462_v13  ;;  %627 = vmatpush1.msra.mxu1 %v464_v14 }
  0xec   :  { %539 = vmatprep.subr.mxu0 %v455_v17  ;;  %628 = vmatprep.subr.mxu1 %v457_v18  ;;  %v343_v52 = vadd.f32 %v342_v21, %v1300_v43  ;;  %v432_v53 = vadd.f32 %v431_v22, %v1300_v43  ;;  %v458_v5 = vmax.f32 %v341_v56, 0.0 }
  0xed   :  { %v346_v27 = vpop.f32.mrf.mxu0  ;;  %v435_v28 = vpop.f32.mrf.mxu1  ;;  %540 = vmatpush1.msra.mxu0 %v454_v19  ;;  %629 = vmatpush1.msra.mxu1 %v456_v20 }
  0xee   :  { %541 = vmatprep.subr.mxu0 %v447_v23  ;;  %630 = vmatprep.subr.mxu1 %v449_v24  ;;  %v347_v48 = vadd.f32 %v346_v27, %v1302_v46  ;;  %v436_v49 = vadd.f32 %v435_v28, %v1302_v46  ;;  %v459_v3 = vmax.f32 %v343_v52, 0.0  ;;  %v461_v4 = vmax.f32 %v432_v53, 0.0 }
  0xef   :  { %v348_v30 = vpop.f32.mrf.mxu0  ;;  %v437_v31 = vpop.f32.mrf.mxu1  ;;  %542 = vmatpush1.msra.mxu0 %v446_v25  ;;  %631 = vmatpush1.msra.mxu1 %v448_v26 }
  0xf0   :  { %1122 = vmatmul.mubr.msk.f32.vlgmr.msra.gmra.mxu0 %vm498_vm1, %v1337_v29  ;;  %1126 = vmatmul.mubr.msk.f32.vlgmr.msra.gmra.mxu1 %vm498_vm1, %v1337_v29  ;;  %v349_v42 = vadd.f32 %v348_v30, %v1302_v46  ;;  %v438_v44 = vadd.f32 %v437_v31, %v1302_v46  ;;  %v430_v46 = vadd.f32 %v1332_v16, %v1300_v43  ;;  %v466_v62 = vmax.f32 %v347_v48, 0.0 }
  0xf1   :  { %v352_v32 = vpop.f32.mrf.mxu0  ;;  %v441_v33 = vpop.f32.mrf.mxu1  ;;  %581 = vmatprep.mubr.f32.mxu0 %v1202_v0  ;;  %670 = vmatprep.mubr.f32.mxu1 %v1202_v0  ;;  %v468_v63 = vmax.f32 %v436_v49, 0.0  ;;  %v424_v43 = vadd.f32 %v1314_v58, %v1316_v59 }
  0xf2   :  { %v353_v35 = vadd.f32 %v352_v32, %v1298_v38  ;;  %v442_v39 = vadd.f32 %v441_v33, %v1298_v38  ;;  %v467_v54 = vmax.f32 %v349_v42, 0.0  ;;  %v469_v55 = vmax.f32 %v438_v44, 0.0  ;;  %v1410_v58 = vpop.permute.xlu1 %487  ;;  %v1412_v59 = vpop.permute.xlu0 %483 }
  0xf3   :  { %v354_v36 = vpop.f32.mrf.mxu0  ;;  %v443_v37 = vpop.f32.mrf.mxu1  ;;  %v460_v6 = vmax.f32 %v430_v46, 0.0  ;;  %v452_v9 = vmax.f32 %v424_v43, 0.0 }
  0xf4   :  { %v355_v40 = vadd.f32 %v354_v36, %v1298_v38  ;;  %v444_v41 = vadd.f32 %v443_v37, %v1298_v38  ;;  %1123 = vmatmul.mubr.msk.f32.gmra.mxu0 %vm498_vm1, %v1348_v34  ;;  %1127 = vmatmul.mubr.msk.f32.gmra.mxu1 %vm498_vm1, %v1348_v34  ;;  %v474_v50 = vmax.f32 %v353_v35, 0.0  ;;  %v476_v51 = vmax.f32 %v442_v39, 0.0 }
  0xf5   :  { %587 = vmatprep.mubr.f32.mxu0 %v1202_v0  ;;  %676 = vmatprep.mubr.f32.mxu1 %v1202_v0 }
  0xf6   :  { %v475_v47 = vmax.f32 %v355_v40, 0.0  ;;  %v477_v38 = vmax.f32 %v444_v41, 0.0  ;;  %v1414_v10 = vpop.permute.xlu1 %491  ;;  %v1416_v15 = vpop.permute.xlu0 %495 }
  0xf8   :  { %1124 = vmatmul.mubr.msk.f32.gmra.mxu0 %vm498_vm1, %v480_v45  ;;  %1128 = vmatmul.mubr.msk.f32.gmra.mxu1 %vm498_vm1, %v480_v45 }
  0xf9   :  { %713 = vmatprep.subr.mxu0 %v475_v47  ;;  %802 = vmatprep.subr.mxu1 %v477_v38 }
  0xfa   :  { %714 = vmatpush1.msra.mxu0 %v474_v50  ;;  %803 = vmatpush1.msra.mxu1 %v476_v51  ;;  %v1422_v21 = vpop.permute.xlu1 %900  ;;  %v1430_v36 = vpop.permute.xlu0 %904 }
  0xfb   :  { %715 = vmatprep.subr.mxu0 %v467_v54  ;;  %804 = vmatprep.subr.mxu1 %v469_v55 }
  0xfc   :  { %593 = vmatprep.mubr.f32.mxu0 %v1202_v0  ;;  %682 = vmatprep.mubr.f32.mxu1 %v1202_v0 }
  0xfd   :  { %716 = vmatpush1.msra.mxu0 %v466_v62  ;;  %805 = vmatpush1.msra.mxu1 %v468_v63 }
  0xfe   :  { %1125 = vmatmul.mubr.msk.f32.gmra.mxu0 %vm498_vm1, %v481_v1  ;;  %1129 = vmatmul.mubr.msk.f32.gmra.mxu1 %vm498_vm1, %v481_v1  ;;  %v1432_v37 = vpop.permute.xlu1 %908 }
  0xff   :  { %717 = vmatprep.subr.mxu0 %v459_v3  ;;  %806 = vmatprep.subr.mxu1 %v461_v4 }
 0x100   :  { %718 = vmatpush1.msra.mxu0 %v458_v5  ;;  %807 = vmatpush1.msra.mxu1 %v460_v6 }
 0x101   :  { %719 = vmatprep.subr.mxu0 %v451_v7  ;;  %808 = vmatprep.subr.mxu1 %v453_v8 }
 0x102   :  { %720 = vmatpush1.msra.mxu0 %v450_v57  ;;  %753 = vmatprep.mubr.f32.mxu0 %v1202_v0  ;;  %v1448_v4 = vpop.permute.xlu1 %912 }
 0x103   :  { %809 = vmatpush1.msra.mxu1 %v452_v9  ;;  %842 = vmatprep.mubr.f32.mxu1 %v1202_v0 }
 0x104   :  { %1130 = vmatmul.mubr.msk.f32.vlgmr.msra.gmra.mxu0 %vm498_vm1, %v1337_v29  ;;  %1134 = vmatmul.mubr.msk.f32.vlgmr.msra.gmra.mxu1 %vm498_vm1, %v1337_v29 }
 0x105   :  { %759 = vmatprep.mubr.f32.mxu0 %v1202_v0  ;;  %848 = vmatprep.mubr.f32.mxu1 %v1202_v0 }
 0x108   :  { %1131 = vmatmul.mubr.msk.f32.gmra.mxu0 %vm498_vm1, %v1348_v34  ;;  %1135 = vmatmul.mubr.msk.f32.gmra.mxu1 %vm498_vm1, %v1348_v34 }
 0x109   :  { %765 = vmatprep.mubr.f32.mxu0 %v1202_v0  ;;  %854 = vmatprep.mubr.f32.mxu1 %v1202_v0 }
 0x10c   :  { %1132 = vmatmul.mubr.msk.f32.gmra.mxu0 %vm498_vm1, %v480_v45  ;;  %1136 = vmatmul.mubr.msk.f32.gmra.mxu1 %vm498_vm1, %v480_v45 }
 0x10d   :  { %771 = vmatprep.mubr.f32.mxu0 %v1202_v0  ;;  %860 = vmatprep.mubr.f32.mxu1 %v1202_v0 }
 0x110   :  { %1133 = vmatmul.mubr.msk.f32.gmra.mxu0 %vm498_vm1, %v481_v1  ;;  %1137 = vmatmul.mubr.msk.f32.gmra.mxu1 %vm498_vm1, %v481_v1 }
 0x1b0   :  { %v577_v11 = vpop.f32.mrf.mxu0  ;;  %v666_v12 = vpop.f32.mrf.mxu1 }
 0x1b1   :  { %v578_v0 = vadd.f32 %v577_v11, %v1412_v59  ;;  %v667_v18 = vadd.f32 %v666_v12, %v1412_v59 }
 0x1b2   :  { %v579_v13 = vpop.f32.mrf.mxu0  ;;  %v668_v14 = vpop.f32.mrf.mxu1 }
 0x1b3   :  { %v580_v22 = vadd.f32 %v579_v13, %v1412_v59  ;;  %v669_v23 = vadd.f32 %v668_v14, %v1412_v59  ;;  %v867_v32 = vmax.f32 %v578_v0, 0.0  ;;  %v869_v33 = vmax.f32 %v667_v18, 0.0 }
 0x1b4   :  { %v583_v16 = vpop.f32.mrf.mxu0  ;;  %v672_v17 = vpop.f32.mrf.mxu1 }
 0x1b5   :  { %v584_v19 = vadd.f32 %v583_v16, %v1410_v58  ;;  %v673_v20 = vadd.f32 %v672_v17, %v1410_v58  ;;  %v868_v39 = vmax.f32 %v580_v22, 0.0  ;;  %v870_v40 = vmax.f32 %v669_v23, 0.0 }
 0x1b6   :  { %v585_v24 = vpop.f32.mrf.mxu0  ;;  %v674_v25 = vpop.f32.mrf.mxu1  ;;  %v915_v52 = vmul.f32 %v1422_v21, %v867_v32  ;;  %v917_v53 = vmul.f32 %v1422_v21, %v869_v33 }
 0x1b7   :  { %v586_v26 = vadd.f32 %v585_v24, %v1410_v58  ;;  %v675_v27 = vadd.f32 %v674_v25, %v1410_v58  ;;  %v875_v28 = vmax.f32 %v584_v19, 0.0  ;;  %v877_v29 = vmax.f32 %v673_v20, 0.0 }
 0x1b8   :  { %v589_v30 = vpop.f32.mrf.mxu0  ;;  %v678_v31 = vpop.f32.mrf.mxu1  ;;  %v916_v1 = vmul.f32 %v1422_v21, %v868_v39  ;;  %v918_v2 = vmul.f32 %v1422_v21, %v870_v40 }
 0x1b9   :  { %v590_v34 = vadd.f32 %v589_v30, %v1414_v10  ;;  %v679_v35 = vadd.f32 %v678_v31, %v1414_v10  ;;  %v876_v41 = vmax.f32 %v586_v26, 0.0  ;;  %v878_v42 = vmax.f32 %v675_v27, 0.0 }
 0x1ba   :  { %v591_v44 = vpop.f32.mrf.mxu0  ;;  %v680_v45 = vpop.f32.mrf.mxu1  ;;  %v923_v50 = vmul.f32 %v1430_v36, %v875_v28  ;;  %v925_v51 = vmul.f32 %v1430_v36, %v877_v29 }
 0x1bb   :  { %v883_v47 = vmax.f32 %v590_v34, 0.0  ;;  %v885_v38 = vmax.f32 %v679_v35, 0.0  ;;  %v592_v48 = vadd.f32 %v591_v44, %v1414_v10  ;;  %v681_v49 = vadd.f32 %v680_v45, %v1414_v10 }
 0x1bc   :  { %v924_v56 = vmul.f32 %v1430_v36, %v876_v41  ;;  %v926_v46 = vmul.f32 %v1430_v36, %v878_v42  ;;  %v947_v57 = vadd.f32 %v923_v50, %v915_v52  ;;  %v965_v9 = vadd.f32 %v925_v51, %v917_v53 }
 0x1bd   :  { %v884_v54 = vmax.f32 %v592_v48, 0.0  ;;  %v886_v55 = vmax.f32 %v681_v49, 0.0  ;;  %v931_v60 = vmul.f32 %v1432_v37, %v883_v47  ;;  %v933_v61 = vmul.f32 %v1432_v37, %v885_v38 }
 0x1be   :  { %v595_v62 = vpop.f32.mrf.mxu0  ;;  %v684_v63 = vpop.f32.mrf.mxu1  ;;  %v956_v17 = vadd.f32 %v924_v56, %v916_v1  ;;  %v974_v18 = vadd.f32 %v926_v46, %v918_v2  ;;  %v1207_v53 = vmov 1966171168  }
 0x1bf   :  { %v596_v43 = vadd.f32 %v595_v62, %v1416_v15  ;;  %v685_v3 = vadd.f32 %v684_v63, %v1416_v15  ;;  %v932_v5 = vmul.f32 %v1432_v37, %v884_v54  ;;  %v934_v6 = vmul.f32 %v1432_v37, %v886_v55 }
 0x1c0   :  { %v597_v7 = vpop.f32.mrf.mxu0  ;;  %v686_v8 = vpop.f32.mrf.mxu1  ;;  %v948_v16 = vadd.f32 %v947_v57, %v931_v60  ;;  %v966_v0 = vadd.f32 %v965_v9, %v933_v61  ;;  %v1462_v54 = vunpack.c.l.s4 %v1207_v53 }
 0x1c1   :  { %v891_v11 = vmax.f32 %v596_v43, 0.0  ;;  %v893_v12 = vmax.f32 %v685_v3, 0.0  ;;  %v598_v13 = vadd.f32 %v597_v7, %v1416_v15  ;;  %v687_v14 = vadd.f32 %v686_v8, %v1416_v15 }
 0x1c2   :  { %v957_v24 = vadd.f32 %v956_v17, %v932_v5  ;;  %v975_v25 = vadd.f32 %v974_v18, %v934_v6 }
 0x1c3   :  { %v892_v19 = vmax.f32 %v598_v13, 0.0  ;;  %v894_v20 = vmax.f32 %v687_v14, 0.0  ;;  %v939_v22 = vmul.f32 %v1448_v4, %v891_v11  ;;  %v941_v23 = vmul.f32 %v1448_v4, %v893_v12 }
 0x1c4   :  { %v755_v26 = vpop.f32.mrf.mxu0  ;;  %v844_v27 = vpop.f32.mrf.mxu1 }
 0x1c5   :  { %v940_v28 = vmul.f32 %v1448_v4, %v892_v19  ;;  %v942_v29 = vmul.f32 %v1448_v4, %v894_v20  ;;  %v949_v30 = vadd.f32 %v948_v16, %v939_v22  ;;  %v967_v31 = vadd.f32 %v966_v0, %v941_v23 }
 0x1c6   :  { %v756_v32 = vadd.f32 %v755_v26, %v1412_v59  ;;  %v845_v33 = vadd.f32 %v844_v27, %v1412_v59  ;;  %v757_v34 = vpop.f32.mrf.mxu0  ;;  %v846_v35 = vpop.f32.mrf.mxu1 }
 0x1c7   :  { %v950_v39 = vrot.slane %v949_v30, 4  ;;  %v958_v40 = vadd.f32 %v957_v24, %v940_v28  ;;  %v968_v41 = vrot.slane %v967_v31, 4  ;;  %v976_v42 = vadd.f32 %v975_v25, %v942_v29 }
 0x1c8   :  { %v871_v44 = vmax.f32 %v756_v32, 0.0  ;;  %v873_v45 = vmax.f32 %v845_v33, 0.0  ;;  %v758_v47 = vadd.f32 %v757_v34, %v1412_v59  ;;  %v847_v38 = vadd.f32 %v846_v35, %v1412_v59  ;;  %v761_v48 = vpop.f32.mrf.mxu0  ;;  %v850_v49 = vpop.f32.mrf.mxu1 }
 0x1c9   :  { %v951_v50 = vadd.f32 %v950_v39, %v949_v30  ;;  %v959_v51 = vrot.slane %v958_v40, 4  ;;  %v977_v52 = vrot.slane %v976_v42, 4  ;;  %v1464_v55 = vadd.f32 %v968_v41, %v967_v31 }
 0x1ca   :  { %v919_v56 = vmul.f32 %v1422_v21, %v871_v44  ;;  %v872_v46 = vmax.f32 %v758_v47, 0.0  ;;  %v874_v60 = vmax.f32 %v847_v38, 0.0  ;;  %v763_v61 = vpop.f32.mrf.mxu0  ;;  %v852_v62 = vpop.f32.mrf.mxu1  ;;  %v921_v1 = vmul.f32 %v1422_v21, %v873_v45 }
 0x1cb   :  { %v960_v63 = vadd.f32 %v959_v51, %v958_v40  ;;  %v762_v59 = vadd.f32 %v761_v48, %v1410_v58  ;;  %v851_v2 = vadd.f32 %v850_v49, %v1410_v58  ;;  %v1470_v43 = vadd.f32 %v977_v52, %v976_v42 }
 0x1cc   :  { %v920_v3 = vmul.f32 %v1422_v21, %v872_v46  ;;  %v764_v5 = vadd.f32 %v763_v61, %v1410_v58  ;;  %v853_v6 = vadd.f32 %v852_v62, %v1410_v58  ;;  %v767_v7 = vpop.f32.mrf.mxu0  ;;  %v856_v8 = vpop.f32.mrf.mxu1  ;;  %v922_v13 = vmul.f32 %v1422_v21, %v874_v60 }
 0x1cd   :  { %v879_v57 = vmax.f32 %v762_v59, 0.0  ;;  %v881_v9 = vmax.f32 %v851_v2, 0.0  ;;  %v768_v11 = vadd.f32 %v767_v7, %v1414_v10  ;;  %v857_v12 = vadd.f32 %v856_v8, %v1414_v10 }
 0x1ce   :  { %v880_v14 = vmax.f32 %v764_v5, 0.0  ;;  %v882_v16 = vmax.f32 %v853_v6, 0.0  ;;  %v769_v17 = vpop.f32.mrf.mxu0  ;;  %v858_v0 = vpop.f32.mrf.mxu1  ;;  %v952_v18 = vrot.slane %v951_v50, 2  ;;  %v961_v31 = vrot.slane %v960_v63, 2 }
 0x1cf   :  { %v927_v19 = vmul.f32 %v1430_v36, %v879_v57  ;;  %v929_v20 = vmul.f32 %v1430_v36, %v881_v9  ;;  %v887_v58 = vmax.f32 %v768_v11, 0.0  ;;  %v889_v22 = vmax.f32 %v857_v12, 0.0 }
 0x1d0   :  { %v928_v23 = vmul.f32 %v1430_v36, %v880_v14  ;;  %v930_v24 = vmul.f32 %v1430_v36, %v882_v16  ;;  %v770_v25 = vadd.f32 %v769_v17, %v1414_v10  ;;  %v859_v26 = vadd.f32 %v858_v0, %v1414_v10  ;;  %v773_v21 = vpop.f32.mrf.mxu0  ;;  %v862_v27 = vpop.f32.mrf.mxu1 }
 0x1d1   :  { %v983_v28 = vadd.f32 %v927_v19, %v919_v56  ;;  %v1001_v29 = vadd.f32 %v929_v20, %v921_v1  ;;  %v935_v30 = vmul.f32 %v1432_v37, %v887_v58  ;;  %v937_v33 = vmul.f32 %v1432_v37, %v889_v22 }
 0x1d2   :  { %v992_v32 = vadd.f32 %v928_v23, %v920_v3  ;;  %v888_v34 = vmax.f32 %v770_v25, 0.0  ;;  %v890_v35 = vmax.f32 %v859_v26, 0.0  ;;  %v775_v39 = vpop.f32.mrf.mxu0  ;;  %v864_v40 = vpop.f32.mrf.mxu1  ;;  %v1010_v41 = vadd.f32 %v930_v24, %v922_v13 }
 0x1d3   :  { %v984_v36 = vadd.f32 %v983_v28, %v935_v30  ;;  %v774_v42 = vadd.f32 %v773_v21, %v1416_v15  ;;  %v863_v10 = vadd.f32 %v862_v27, %v1416_v15  ;;  %v776_v47 = vadd.f32 %v775_v39, %v1416_v15  ;;  %v1022_v24 = vpop.permute.xlu0 %1021 }
 0x1d4   :  { %v936_v44 = vmul.f32 %v1432_v37, %v888_v34  ;;  %v938_v45 = vmul.f32 %v1432_v37, %v890_v35  ;;  %v865_v38 = vadd.f32 %v864_v40, %v1416_v15  ;;  %v953_v51 = vadd.f32 %v952_v18, %v951_v50 }
 0x1d5   :  { %v895_v48 = vmax.f32 %v774_v42, 0.0  ;;  %v897_v49 = vmax.f32 %v863_v10, 0.0  ;;  %v962_v52 = vadd.f32 %v961_v31, %v960_v63  ;;  %v1002_v53 = vadd.f32 %v1001_v29, %v937_v33 }
 0x1d6   :  { %v993_v56 = vadd.f32 %v992_v32, %v936_v44  ;;  %v896_v46 = vmax.f32 %v776_v47, 0.0  ;;  %v898_v60 = vmax.f32 %v865_v38, 0.0  ;;  %v1011_v61 = vadd.f32 %v1010_v41, %v938_v45 }
 0x1d7   :  { %v943_v62 = vmul.f32 %v1448_v4, %v895_v48  ;;  %v945_v1 = vmul.f32 %v1448_v4, %v897_v49  ;;  %v963_v59 = vrot.slane %v962_v52, 1  ;;  %v970_v15 = vrot.slane %v1464_v55, 2 }
 0x1d8   :  { %v944_v37 = vmul.f32 %v1448_v4, %v896_v46  ;;  %v946_v2 = vmul.f32 %v1448_v4, %v898_v60  ;;  %v979_v3 = vrot.slane %v1470_v43, 2  ;;  %v954_v5 = vrot.slane %v953_v51, 1 }
 0x1d9   :  { %v985_v50 = vadd.f32 %v984_v36, %v943_v62  ;;  %v1003_v63 = vadd.f32 %v1002_v53, %v945_v1  ;;  %v1047_v6 = vlaneseq  ;;  %v971_v57 = vadd.f32 %v970_v15, %v1464_v55 }
 0x1da   :  { %v994_v7 = vadd.f32 %v993_v56, %v944_v37  ;;  %v1012_v8 = vadd.f32 %v1011_v61, %v946_v2  ;;  %v980_v9 = vadd.f32 %v979_v3, %v1470_v43  ;;  %v964_v13 = vadd.f32 %v963_v59, %v962_v52 }
 0x1db   :  { %v986_v11 = vrot.slane %v985_v50, 4  ;;  %v1004_v12 = vrot.slane %v1003_v63, 4  ;;  %v1046_v14 = vunpack.c.0.s8 %v1462_v54  ;;  %v972_v17 = vrot.slane %v971_v57, 1 }
 0x1dc   :  { %v995_v4 = vrot.slane %v994_v7, 4  ;;  %v1013_v16 = vrot.slane %v1012_v8, 4  ;;  %v981_v0 = vrot.slane %v980_v9, 1  ;;  %v955_v20 = vadd.f32 %v954_v5, %v953_v51 }
 0x1dd   :  { %v987_v18 = vadd.f32 %v986_v11, %v985_v50  ;;  %v1005_v19 = vadd.f32 %v1004_v12, %v1003_v63  ;;  %v1048_v58 = vshrl.u32 %v1047_v6, 7  ;;  %v973_v25 = vadd.f32 %v972_v17, %v971_v57 }
 0x1de   :  { %v996_v22 = vadd.f32 %v995_v4, %v994_v7  ;;  %v1014_v23 = vadd.f32 %v1013_v16, %v1012_v8  ;;  %v982_v55 = vadd.f32 %v981_v0, %v980_v9  ;;  %v1025_v21 = vadd.f32 %v1022_v24, %v964_v13 }
 0x1df   :  { %v988_v26 = vrot.slane %v987_v18, 2  ;;  %v1006_v43 = vrot.slane %v1005_v19, 2  ;;  %v1024_v31 = vadd.f32 %v1022_v24, %v955_v20  ;;  %v1026_v32 = vadd.f32 %v1022_v24, %v973_v25 }
 0x1e0   :  { %v997_v27 = vrot.slane %v996_v22, 2  ;;  %v1015_v28 = vrot.slane %v1014_v23, 2  ;;  %v1027_v29 = vadd.f32 %v1022_v24, %v982_v55  ;;  %v1049_v35 = vsub.s32 %v1046_v14, %v1048_v58 }
 0x1e1   :  { %v989_v54 = vadd.f32 %v988_v26, %v987_v18  ;;  %v1007_v30 = vadd.f32 %v1006_v43, %v1005_v19  ;;  %v1040_v41 = vcombine.low %v1024_v31, %v1025_v21 }
 0x1e2   :  { %v998_v33 = vadd.f32 %v997_v27, %v996_v22  ;;  %v1016_v34 = vadd.f32 %v1015_v28, %v1014_v23  ;;  %v1041_v36 = vcombine.low %v1026_v32, %v1027_v29 }
 0x1e3   :  { %v990_v39 = vrot.slane %v989_v54, 1  ;;  %v1008_v40 = vrot.slane %v1007_v30, 1  ;;  %v1050_v48 = vrot.slane %v1040_v41, %v1049_v35 }
 0x1e4   :  { %v999_v42 = vrot.slane %v998_v33, 1  ;;  %v1017_v10 = vrot.slane %v1016_v34, 1  ;;  %v1057_v49 = vrot.slane %v1041_v36, %v1049_v35 }
 0x1e5   :  { %v991_v44 = vadd.f32 %v990_v39, %v989_v54  ;;  %v1009_v45 = vadd.f32 %v1008_v40, %v1007_v30 }
 0x1e6   :  { %v1000_v47 = vadd.f32 %v999_v42, %v998_v33  ;;  %v1018_v38 = vadd.f32 %v1017_v10, %v1016_v34  ;;  %v1072_v1 = vcombine.low %v1050_v48, %v1057_v49 }
 0x1e7   :  { %v1028_v51 = vadd.f32 %v1022_v24, %v991_v44  ;;  %v1030_v53 = vadd.f32 %v1022_v24, %v1009_v45 }
 0x1e8   :  { %v1029_v52 = vadd.f32 %v1022_v24, %v1000_v47  ;;  %v1031_v56 = vadd.f32 %v1022_v24, %v1018_v38  ;;  %v1080_v37 = vrot.slane %v1072_v1, %v1049_v35 }
 0x1ea   :  { %v1042_v46 = vcombine.low %v1028_v51, %v1029_v52  ;;  %v1043_v60 = vcombine.low %v1030_v53, %v1031_v56 }
 0x1ec   :  { %v1064_v61 = vrot.slane %v1042_v46, %v1049_v35  ;;  %v1071_v62 = vrot.slane %v1043_v60, %v1049_v35 }
 0x1ee   :  { %v1073_v59 = vcombine.low %v1064_v61, %v1071_v62 }
 0x1f0   :  { %v1087_v2 = vrot.slane %v1073_v59, %v1049_v35 }
 0x1f2   :  { %v1088_v15 = vcombine.low %v1080_v37, %v1087_v2 }
 0x1f4   :  { %1090 = vst [vmem:[#allocation5] sm:$0xff] %v1088_v15 }
 0x1f5   :  { %1186 = shalt.err (!%p1183_p9)
}
 0x1f6   :  { %1100 = dma.vmem_to_hbm [thread:$0]  %s1098_s19, 128, %s1508_s4, [#allocation4]  }
 0x1f7   :  { %1197 = dma.done.wait [#allocation4], 128  }
 0x1f8   :  { %1198 = vsyncadd [#allocation4], 4294967168 }
 0x1f9   :  { %1104 = vsyncpa [#allocation3], 1 }
 0x1fa   :  { %1105 = vsyncpa [#allocation4], 1 }

</bundles_post_ra>
